<compile_context>
chip_gen: v7x
topology: tpu7x:2x2x1
jax: 0.10.0
libtpu: 0.0.40
codegen_flags: <defaults>
</compile_context>

<pallas_src>
import jax
import jax.numpy as jnp
from jax.experimental import pallas as pl
from jax.experimental.pallas import tpu as pltpu


def _eca_kernel(w_ref, x_ref, o_ref):
    # w_ref: SMEM (3,) conv1d weights (k_size = 3)
    # x_ref: VMEM (Bt, C, HW) block
    # o_ref: VMEM (Bt, C, HW) block
    bt, c, hw = x_ref.shape

    # ---- Global average pool over HW (lane axis), f32 accumulation. ----------
    # keepdims keeps C on the sublane axis so the gate (Bt, C, 1) broadcasts
    # over HW without any lane<->sublane relayout.
    s = jnp.sum(x_ref[...].astype(jnp.float32), axis=2, keepdims=True)   # (Bt,C,1)
    m = s * (1.0 / hw)

    # ---- Conv1d(1, 1, k=3, pad=1, bias=False) along the channel axis. --------
    # y[c] = w0*m[c-1] + w1*m[c] + w2*m[c+1], zero padded at both ends.
    zero = jnp.zeros((bt, 1, 1), dtype=jnp.float32)
    m_left = jnp.concatenate([zero, m[:, : c - 1, :]], axis=1)           # m[c-1]
    m_right = jnp.concatenate([m[:, 1:, :], zero], axis=1)               # m[c+1]
    y = w_ref[0] * m_left + w_ref[1] * m + w_ref[2] * m_right            # (Bt,C,1)

    # ---- Sigmoid gate, then scale x in the input dtype (matches PyTorch). ----
    gate = jax.nn.sigmoid(y).astype(o_ref.dtype)                         # (Bt,C,1)
    # Re-read x_ref here so no block-sized value stays live across the body.
    o_ref[...] = x_ref[...] * gate


def _choose_batch_tile(b, per_batch_bytes, target_bytes=4 << 20):
    """Largest divisor of b whose packed (Bt, C, HW) block stays <= target."""
    for cand in range(b, 0, -1):
        if b % cand == 0 and cand * per_batch_bytes <= target_bytes:
            return cand
    return 1


def eca_layer_pallas(x, conv_weight, *, donate_x=False):
    """ECA forward.

    Args:
      x: (B, C, H, W) array (NCHW, like the PyTorch module).
      conv_weight: (3,) conv1d weights (PyTorch shape (1, 1, 3) squeezed).
      donate_x: if True and the caller no longer needs x, alias x's buffer to the
        output (saves an HBM allocation; does not change semantics of the result).

    Returns:
      (B, C, H, W) array, same dtype as x.
    """
    b, c, h, w = x.shape
    hw = h * w
    x_flat = x.reshape(b, c, hw)

    itemsize = jnp.dtype(x.dtype).itemsize
    per_batch_bytes = c * hw * itemsize
    bt = _choose_batch_tile(b, per_batch_bytes)
    block_bytes = bt * per_batch_bytes

    # In-flight VMEM ~= 2 pipeline buffers x (input + output) blocks, plus slack.
    # Clamp to 64 MiB so the request is valid on v7x (64 MiB physical VMEM).
    # TODO(synk): when a single per-batch block needs more than ~56 MiB of VMEM
    # (huge C*HW on v7x), split into a two-phase grid (pool pass over HW tiles,
    # then gate-apply pass) instead of one monolithic (1, C, HW) block.
    vmem_limit = int(min(max(4 * block_bytes + (2 << 20), 32 << 20), 64 << 20))

    cost = pl.CostEstimate(
        flops=2 * b * c * hw + 8 * b * c,
        transcendentals=b * c,
        bytes_accessed=2 * b * c * hw * itemsize
        + 3 * jnp.dtype(conv_weight.dtype).itemsize,
    )

    extra_kwargs = {}
    if donate_x:
        extra_kwargs["input_output_aliases"] = {1: 0}   # x_flat -> out_flat

    out_flat = pl.pallas_call(
        _eca_kernel,
        out_shape=jax.ShapeDtypeStruct((b, c, hw), x.dtype),
        grid_spec=pltpu.PrefetchScalarGridSpec(
            num_scalar_prefetch=0,
            grid=(b // bt,),
            in_specs=[
                pl.BlockSpec(memory_space=pltpu.MemorySpace.SMEM),   # conv weights
                pl.BlockSpec((bt, c, hw), lambda i: (i, 0, 0)),      # x block
            ],
            out_specs=pl.BlockSpec((bt, c, hw), lambda i: (i, 0, 0)),
        ),
        compiler_params=pltpu.CompilerParams(
            dimension_semantics=("parallel",),
            vmem_limit_bytes=vmem_limit,
        ),
        cost_estimate=cost,
        **extra_kwargs,
    )(conv_weight, x_flat)

    return out_flat.reshape(b, c, h, w)


def _eca_reference(x, conv_weight):
    """Pure-JAX reference matching the PyTorch forward."""
    m = jnp.mean(x, axis=(2, 3))                         # (B, C)
    m_pad = jnp.pad(m, ((0, 0), (1, 1)))                 # zero pad channels
    y = (conv_weight[0] * m_pad[:, :-2]
         + conv_weight[1] * m_pad[:, 1:-1]
         + conv_weight[2] * m_pad[:, 2:])                # (B, C)
    gate = jax.nn.sigmoid(y)
    return x * gate[:, :, None, None]


if __name__ == "__main__":
    key = jax.random.PRNGKey(0)
    kx, kw = jax.random.split(key)

    # Small shapes consistent with the module: batch=2, channels=4, spatial=16.
    B, C, H, W = 2, 4, 16, 16
    x = jax.random.normal(kx, (B, C, H, W), dtype=jnp.float32)

    # Deterministic Conv1d(1, 1, kernel_size=3, bias=False) weight, shape (3,).
    conv_weight = jax.random.normal(kw, (3,), dtype=jnp.float32) * 0.5

    out = jax.block_until_ready(eca_layer_pallas(x, conv_weight))
    ref = _eca_reference(x, conv_weight)
    assert out.shape == x.shape
    assert jnp.allclose(out, ref, atol=1e-5, rtol=1e-5)

    # Extra check: non-128-multiple spatial size (masked-store path) and C=8.
    x2 = jax.random.normal(jax.random.PRNGKey(1), (2, 8, 7, 7), dtype=jnp.float32)
    out2 = jax.block_until_ready(eca_layer_pallas(x2, conv_weight))
    ref2 = _eca_reference(x2, conv_weight)
    assert jnp.allclose(out2, ref2, atol=1e-5, rtol=1e-5)

    print("KERNEL_OK")
</pallas_src>

<mosaic_0001>
module attributes {stable_mosaic.version = 11 : i64} {
  func.func @_eca_kernel(%arg0: i32, %arg1: memref<3xf32, #tpu.memory_space<smem>>, %arg2: memref<2x4x256xf32, #tpu.memory_space<vmem>>, %arg3: memref<2x4x256xf32, #tpu.memory_space<vmem>>) attributes {dimension_semantics = [#tpu.dimension_semantics<parallel>], iteration_bounds = array<i64: 1>, scalar_prefetch = 0 : i64, scratch_operands = 0 : i64, tpu.core_type = #tpu.core_type<tc>, window_params = [{transform_indices = @transform_0, window_bounds = array<i64: 3>}, {transform_indices = @transform_1, window_bounds = array<i64: 2, 4, 256>}, {transform_indices = @transform_2, window_bounds = array<i64: 2, 4, 256>}]} {
    %c0 = arith.constant 0 : index
    %c0_0 = arith.constant 0 : index
    %c0_1 = arith.constant 0 : index
    %0 = vector.load %arg2[%c0, %c0_0, %c0_1] : memref<2x4x256xf32, #tpu.memory_space<vmem>>, vector<2x4x256xf32>
    %cst = arith.constant dense<0.000000e+00> : vector<2x4xf32>
    %1 = vector.multi_reduction <add>, %0, %cst [2] : vector<2x4x256xf32> to vector<2x4xf32>
    %2 = vector.shape_cast %1 : vector<2x4xf32> to vector<2x4x1xf32>
    %cst_2 = arith.constant 3.906250e-03 : f32
    %3 = vector.broadcast %cst_2 : f32 to vector<2x4x1xf32>
    %4 = arith.mulf %2, %3 : vector<2x4x1xf32>
    %cst_3 = arith.constant 0.000000e+00 : f32
    %5 = vector.broadcast %cst_3 : f32 to vector<2x1x1xf32>
    %6 = vector.extract_strided_slice %4 {offsets = [0, 0, 0], sizes = [2, 3, 1], strides = [1, 1, 1]} : vector<2x4x1xf32> to vector<2x3x1xf32>
    %7 = tpu.concatenate %5, %6 in 1 : vector<2x1x1xf32>, vector<2x3x1xf32> -> vector<2x4x1xf32>
    %8 = vector.extract_strided_slice %4 {offsets = [0, 1, 0], sizes = [2, 3, 1], strides = [1, 1, 1]} : vector<2x4x1xf32> to vector<2x3x1xf32>
    %9 = tpu.concatenate %8, %5 in 1 : vector<2x3x1xf32>, vector<2x1x1xf32> -> vector<2x4x1xf32>
    %c0_4 = arith.constant 0 : index
    %10 = memref.load %arg1[%c0_4] : memref<3xf32, #tpu.memory_space<smem>>
    %11 = vector.broadcast %10 : f32 to vector<2x4x1xf32>
    %12 = arith.mulf %11, %7 : vector<2x4x1xf32>
    %c1 = arith.constant 1 : index
    %13 = memref.load %arg1[%c1] : memref<3xf32, #tpu.memory_space<smem>>
    %14 = vector.broadcast %13 : f32 to vector<2x4x1xf32>
    %15 = arith.mulf %14, %4 : vector<2x4x1xf32>
    %16 = arith.addf %12, %15 : vector<2x4x1xf32>
    %c2 = arith.constant 2 : index
    %17 = memref.load %arg1[%c2] : memref<3xf32, #tpu.memory_space<smem>>
    %18 = vector.broadcast %17 : f32 to vector<2x4x1xf32>
    %19 = arith.mulf %18, %9 : vector<2x4x1xf32>
    %20 = arith.addf %16, %19 : vector<2x4x1xf32>
    %21 = arith.negf %20 : vector<2x4x1xf32>
    %22 = math.exp %21 : vector<2x4x1xf32>
    %cst_5 = arith.constant 1.000000e+00 : f32
    %23 = vector.broadcast %cst_5 : f32 to vector<2x4x1xf32>
    %24 = arith.addf %23, %22 : vector<2x4x1xf32>
    %25 = arith.divf %23, %24 : vector<2x4x1xf32>
    %c0_6 = arith.constant 0 : index
    %c0_7 = arith.constant 0 : index
    %c0_8 = arith.constant 0 : index
    %26 = vector.load %arg2[%c0_6, %c0_7, %c0_8] : memref<2x4x256xf32, #tpu.memory_space<vmem>>, vector<2x4x256xf32>
    %27 = vector.broadcast %25 : vector<2x4x1xf32> to vector<2x4x256xf32>
    %28 = arith.mulf %26, %27 : vector<2x4x256xf32>
    %c0_9 = arith.constant 0 : index
    %c0_10 = arith.constant 0 : index
    %c0_11 = arith.constant 0 : index
    %29 = vector.load %arg3[%c0_9, %c0_10, %c0_11] : memref<2x4x256xf32, #tpu.memory_space<vmem>>, vector<2x4x256xf32>
    tpu.vector_store %arg3[%c0_9, %c0_10, %c0_11], %28 {strides = array<i32>} : memref<2x4x256xf32, #tpu.memory_space<vmem>>, vector<2x4x256xf32>,
    return
  }
  func.func @transform_0(%arg0: i32) -> i32 {
    %c0_i32 = arith.constant 0 : i32
    %c0_i32_0 = arith.constant 0 : i32
    return %c0_i32 : i32
  }
  func.func @transform_1(%arg0: i32) -> (i32, i32, i32) {
    %c0_i32 = arith.constant 0 : i32
    %c0_i32_0 = arith.constant 0 : i32
    %c0_i32_1 = arith.constant 0 : i32
    return %arg0, %c0_i32, %c0_i32_0 : i32, i32, i32
  }
  func.func @transform_2(%arg0: i32) -> (i32, i32, i32) {
    %c0_i32 = arith.constant 0 : i32
    %c0_i32_0 = arith.constant 0 : i32
    %c0_i32_1 = arith.constant 0 : i32
    return %arg0, %c0_i32, %c0_i32_0 : i32, i32, i32
  }
}

</mosaic_0001>

<bundles_post_ra>
// kernel: tpu_custom_call.1
= control target key start
LH: loop header
LB: loop body
LE: loop exit
PB: predicated region body
PF: predicated region fallthrough
CT: control target
= control target key end

     0   :  { %7 = vsyncpa [#allocation5], 0  ;;  %s311_s0 = inlined_call_operand.hbm [shape: f32[3], index: 0, kind: input, shape index: {}]   ;;  %s312_s1 = inlined_call_operand.hbm [shape: f32[2,4,256], index: 1, kind: input, shape index: {}]   ;;  %s313_s2 = inlined_call_operand.hbm [shape: f32[2,4,256], index: 2, kind: output, shape index: {}]  }
   0x1   :  { %8 = vsyncpa [#allocation3], 0 }
   0x2   :  { %9 = vsyncpa [#allocation4], 0  ;;  %s171_s11 = scalar_lea.hbm %s311_s0, 16 }
   0x3   :  { %p172_p0 = scmp.ne.s32.totalorder %s311_s0, %s171_s11  ;;  %p175_p1 = scmp.lt.u32.totalorder %s171_s11, %s311_s0 }
   0x5   :  { %p177_p2 = pnand %p175_p1, %p172_p0 }
   0x7   :  { %180 = shalt.err (!%p177_p2)
}
   0x8   :  { %s231_s16 = smov [#allocation2]   ;;  %s232_s19 = smov [#allocation6]  }
   0x9   :  { %17 = dma.hbm_to_smem %s311_s0, 16, %s231_s16, [#allocation5]  }
   0xa   :  { %s23_s20 = sshll.u32 %s232_s19, 4  ;;  %s181_s23 = scalar_lea.hbm %s312_s1, 256  ;;  %s24_s20 = int_to_ptr.vmem [resolvable:$true] %s23_s20 }
   0xb   :  { %p182_p3 = scmp.ne.s32.totalorder %s312_s1, %s181_s23  ;;  %p185_p4 = scmp.lt.u32.totalorder %s181_s23, %s312_s1 }
   0xd   :  { %p187_p5 = pnand %p185_p4, %p182_p3 }
   0xf   :  { %190 = shalt.err (!%p187_p5)
}
  0x10   :  { %s191_s28 = scalar_lea.vmem %s24_s20, 256  ;;  %p196_p7 = scmp.lt.s32.totalorder %s24_s20, %s24_s20 }
  0x11   :  { %p192_p6 = scmp.ne.s32.totalorder %s24_s20, %s191_s28  ;;  %p197_p8 = scmp.lt.s32.totalorder %s191_s28, %s191_s28 }
  0x13   :  { %p198_p9 = por %p197_p8, %p196_p7 }
  0x15   :  { %p199_p10 = pnand %p198_p9, %p192_p6 }
  0x17   :  { %202 = shalt.err (!%p199_p10)
}
  0x18   :  { %s233_s0 = smov 128   ;;  %s234_s29 = smov 8  }
  0x19   :  { %29 = dma.hbm_to_vmem [thread:$0]  %s312_s1, 256, %s24_s20, [#allocation3], %s233_s0, %s233_s0, %s234_s29  }
  0x1a   :  { %225 = dma.done.wait [#allocation5], 16  }
  0x1b   :  { %226 = vsyncadd [#allocation5], 4294967280 }
  0x1c   :  { %227 = dma.done.wait [#allocation3], 256  }
  0x1d   :  { %228 = vsyncadd [#allocation3], 4294967040 }
  0x1e   :  { %36 = sfence }
  0x1f   :  { %v280_v0 = vld [vmem:[#allocation6] sm:$0xff]  ;;  %vm45_vm0 = vcmask 1043456   ;;  %v282_v1 = vld [vmem:[#allocation6 + $0x8] sm:$0xff]  ;;  %v235_v10 = vmov 0   ;;  %s74_s1 = sld [smem:[#allocation2]]  ;;  %s148_s4 = sld [smem:[#allocation2 + $0x1]]  ;;  %v113_v46 = vlaneseq }
  0x20   :  { %v41_v2 = vcombine.high %v280_v0, %v280_v0  ;;  %v46_v3 = vsel %vm45_vm0, %v280_v0, 0.0  ;;  %v42_v4 = vcombine.high %v282_v1, %v282_v1  ;;  %v51_v6 = vsel %vm45_vm0, %v282_v1, 0.0  ;;  %159 = vset.pattern.permute.xlu1 %v235_v10  ;;  %160 = vset.pattern.permute.xlu0 %v235_v10  ;;  %s149_s5 = sld [smem:[#allocation2 + $0x2]]  ;;  %s237_s6 = smov [#allocation7]  }
  0x21   :  { %vm64_vm1 = vcmask 1040384   ;;  %vm71_vm2 = vcmask 1042432   ;;  %v236_v44 = vmov 839922192   ;;  %v114_v48 = vshrl.u32 %v113_v46, 7  ;;  %s135_s7 = sshll.u32 %s237_s6, 4  ;;  %s136_s7 = int_to_ptr.vmem [resolvable:$true] %s135_s7 }
  0x22   :  { %v47_v5 = vsel %vm45_vm0, %v41_v2, 0.0  ;;  %v52_v7 = vsel %vm45_vm0, %v42_v4, 0.0  ;;  %v111_v45 = vunpack.c.l.s4 %v236_v44  ;;  %s203_s8 = scalar_lea.vmem %s136_s7, 256  ;;  %p208_p12 = scmp.lt.s32.totalorder %s136_s7, %s136_s7 }
  0x23   :  { %v48_v8 = vadd.f32 %v47_v5, %v46_v3  ;;  %v53_v9 = vadd.f32 %v52_v7, %v51_v6  ;;  %p204_p11 = scmp.ne.s32.totalorder %s136_s7, %s203_s8  ;;  %p209_p13 = scmp.lt.s32.totalorder %s203_s8, %s203_s8 }
  0x24   :  { %v112_v47 = vunpack.c.0.s8 %v111_v45 }
  0x25   :  { %49 = vadd.xlane.f32.xlu0 %v48_v8  ;;  %v75_v13 = vstv %s74_s1  ;;  %v79_v14 = vstv %s148_s4  ;;  %p210_p0 = por %p209_p13, %p208_p12 }
  0x26   :  { %v85_v18 = vstv %s149_s5  ;;  %v115_v49 = vsub.s32 %v112_v47, %v114_v48 }
  0x27   :  { %p211_p1 = pnand %p210_p0, %p204_p11 }
  0x29   :  { %54 = vadd.xlane.f32.xlu0 %v53_v9 }
  0xb2   :  { %v50_v11 = vpop.xlane.xlu0 %49 }
  0xb3   :  { %v56_v12 = vmul.f32 0.00390625, %v50_v11 }
  0xb5   :  { %v60_v15 = vrot.slane %v56_v12, 7  ;;  %v67_v16 = vrot.slane %v56_v12, 1  ;;  %v80_v23 = vmul.f32 %v79_v14, %v56_v12 }
  0xb6   :  { %v55_v17 = vpop.xlane.xlu0 %54 }
  0xb7   :  { %v65_v19 = vsel %vm64_vm1, 0.0, %v60_v15  ;;  %v72_v20 = vsel %vm71_vm2, %v67_v16, 0.0  ;;  %v57_v21 = vmul.f32 0.00390625, %v55_v17 }
  0xb8   :  { %v76_v22 = vmul.f32 %v75_v13, %v65_v19  ;;  %v86_v27 = vmul.f32 %v85_v18, %v72_v20 }
  0xb9   :  { %v61_v24 = vrot.slane %v57_v21, 7  ;;  %v68_v25 = vrot.slane %v57_v21, 1  ;;  %v81_v32 = vmul.f32 %v79_v14, %v57_v21 }
  0xba   :  { %v82_v26 = vadd.f32 %v80_v23, %v76_v22 }
  0xbb   :  { %v66_v28 = vsel %vm64_vm1, 0.0, %v61_v24  ;;  %v73_v29 = vsel %vm71_vm2, %v68_v25, 0.0 }
  0xbc   :  { %v88_v30 = vadd.f32 %v86_v27, %v82_v26  ;;  %v77_v31 = vmul.f32 %v75_v13, %v66_v28  ;;  %v87_v35 = vmul.f32 %v85_v18, %v73_v29 }
  0xbe   :  { %v150_v33 = vmul.f32 -1.442695, %v88_v30  ;;  %v83_v34 = vadd.f32 %v81_v32, %v77_v31 }
  0xc0   :  { %163 = vpow2.f32 %v150_v33  ;;  %v89_v36 = vadd.f32 %v87_v35, %v83_v34 }
  0xc2   :  { %v151_v37 = vmul.f32 -1.442695, %v89_v36 }
  0xc4   :  { %165 = vpow2.f32 %v151_v37 }
  0xca   :  { %v164_v38 = vpop.eup %163 }
  0xcb   :  { %v96_v39 = vadd.f32 1.0, %v164_v38 }
  0xcd   :  { %167 = vrcp.f32 %v96_v39 }
  0xce   :  { %v166_v40 = vpop.eup %165 }
  0xcf   :  { %v97_v41 = vadd.f32 1.0, %v166_v40 }
  0xd1   :  { %169 = vrcp.f32 %v97_v41 }
  0xd7   :  { %v168_v42 = vpop.eup %167 }
  0xd8   :  { %104 = vperm.xlu1 %159, %v168_v42  }
  0xdb   :  { %v170_v43 = vpop.eup %169 }
  0xdc   :  { %108 = vperm.xlu1 %159, %v170_v43  }
 0x157   :  { %v105_v50 = vpop.permute.xlu1 %104 }
 0x158   :  { %v116_v51 = vrot.slane %v105_v50, %v115_v49 }
 0x15a   :  { %v126_v52 = vmul.f32 %v116_v51, %v280_v0 }
 0x15b   :  { %v109_v53 = vpop.permute.xlu1 %108 }
 0x15c   :  { %v123_v54 = vrot.slane %v109_v53, %v115_v49  ;;  %128 = vst [vmem:[#allocation7] sm:$0xff] %v126_v52 }
 0x15e   :  { %v127_v55 = vmul.f32 %v123_v54, %v282_v1 }
 0x160   :  { %129 = vst [vmem:[#allocation7 + $0x8] sm:$0xff] %v127_v55 }
 0x161   :  { %214 = shalt.err (!%p211_p1)
}
 0x162   :  { %s215_s11 = scalar_lea.hbm %s313_s2, 256 }
 0x163   :  { %p216_p2 = scmp.ne.s32.totalorder %s313_s2, %s215_s11  ;;  %p219_p3 = scmp.lt.u32.totalorder %s215_s11, %s313_s2 }
 0x165   :  { %p221_p4 = pnand %p219_p3, %p216_p2 }
 0x167   :  { %224 = shalt.err (!%p221_p4)
}
 0x168   :  { %141 = dma.vmem_to_hbm [thread:$0]  %s136_s7, 256, %s313_s2, [#allocation4], %s233_s0, %s233_s0, %s234_s29  }
 0x169   :  { %229 = dma.done.wait [#allocation4], 256  }
 0x16a   :  { %230 = vsyncadd [#allocation4], 4294967040 }
 0x16b   :  { %145 = vsyncpa [#allocation3], 1 }
 0x16c   :  { %146 = vsyncpa [#allocation4], 1 }
 0x16d   :  { %147 = vsyncpa [#allocation5], 1 }

</bundles_post_ra>
